<compile_context>
chip_gen: v7x
topology: tpu7x:2x2x1
jax: 0.10.0
libtpu: 0.0.40
codegen_flags: <defaults>
</compile_context>

<pallas_src>
import functools

import jax
import jax.numpy as jnp
from jax.experimental import pallas as pl
from jax.experimental.pallas import tpu as pltpu


def _masked_layernorm_kernel(x_ref, m_ref, g_ref, b_ref, o_ref, *, eps):
    # x_ref: (TM, D)  native-dtype row tile (D = full feature extent)
    # m_ref: (TM, 1)  integer per-row mask (>0 => normalize this row)
    # g_ref: (1, D)   LayerNorm weight
    # b_ref: (1, D)   LayerNorm bias
    # o_ref: (TM, D)  output tile (same dtype as x)
    x = x_ref[...].astype(jnp.float32)
    d = x.shape[-1]
    inv_d = jnp.float32(1.0 / d)

    s1 = jnp.sum(x, axis=-1, keepdims=True)          # (TM, 1)
    s2 = jnp.sum(x * x, axis=-1, keepdims=True)      # (TM, 1)
    mean = s1 * inv_d
    # Clamp: one-pass variance can go slightly negative in f32.
    var = jnp.maximum(s2 * inv_d - mean * mean, jnp.float32(0.0))
    inv_std = jax.lax.rsqrt(var + jnp.float32(eps))  # EUP slot

    gamma = g_ref[...].astype(jnp.float32)
    beta = b_ref[...].astype(jnp.float32)
    normed = (x - mean) * inv_std * gamma + beta

    keep = m_ref[...] > 0                            # (TM, 1) broadcast blend
    o_ref[...] = jnp.where(keep, normed, x).astype(o_ref.dtype)


def _layernorm_kernel(x_ref, g_ref, b_ref, o_ref, *, eps):
    # Eval-path specialization: no mask stream, no blend.
    x = x_ref[...].astype(jnp.float32)
    d = x.shape[-1]
    inv_d = jnp.float32(1.0 / d)

    s1 = jnp.sum(x, axis=-1, keepdims=True)
    s2 = jnp.sum(x * x, axis=-1, keepdims=True)
    mean = s1 * inv_d
    var = jnp.maximum(s2 * inv_d - mean * mean, jnp.float32(0.0))
    inv_std = jax.lax.rsqrt(var + jnp.float32(eps))

    gamma = g_ref[...].astype(jnp.float32)
    beta = b_ref[...].astype(jnp.float32)
    o_ref[...] = ((x - mean) * inv_std * gamma + beta).astype(o_ref.dtype)


def _pick_row_tile(n_rows, d, itemsize, block_rows, vmem_budget_bytes):
    """Largest row tile <= block_rows whose double-buffered x+out footprint
    stays within the VMEM budget, kept a multiple of 8 (or == N)."""
    # 2 buffers for the x stream + 2 for the out stream (mask/params are tiny).
    bytes_per_row = 4 * d * itemsize
    max_rows = max(8, vmem_budget_bytes // max(bytes_per_row, 1))
    tm = min(block_rows, max_rows)
    if tm >= n_rows:
        return n_rows                      # full extent: exempt from the 8-rule
    return max(8, (tm // 8) * 8)


def masked_norm_forward(x, mask, gamma, beta, *, eps=1e-5, training=True,
                        block_rows=1024, vmem_budget_bytes=24 << 20):
    """MaskedNorm.forward with norm_type='layer'.

    x:     (B, T, D) float (any float dtype; output has the same dtype)
    mask:  (B, T)    bool / int / float, >0 marks valid positions
    gamma: (D,)      LayerNorm weight
    beta:  (D,)      LayerNorm bias
    Returns (B, T, D) in x.dtype.
    """
    B, T, D = x.shape
    N = B * T
    itemsize = jnp.dtype(x.dtype).itemsize

    xf = x.reshape(N, D)                    # free reshape, no copy / no cast
    g = gamma.reshape(1, D)
    b = beta.reshape(1, D)

    TM = _pick_row_tile(N, D, itemsize, block_rows, vmem_budget_bytes)
    grid = (pl.cdiv(N, TM),)

    x_spec = pl.BlockSpec((TM, D), lambda i: (i, 0))       # streamed row tiles
    prm_spec = pl.BlockSpec((1, D), lambda i: (0, 0))       # resident gamma/beta
    out_spec = pl.BlockSpec((TM, D), lambda i: (i, 0))
    compiler_params = pltpu.CompilerParams(
        dimension_semantics=("parallel",),                   # v7x: 2 TCs
        vmem_limit_bytes=32 << 20,
    )

    if training:
        m = mask.reshape(N, 1)
        if m.dtype == jnp.bool_:
            m = m.astype(jnp.int32)                          # tiny (N,) cast
        kernel = functools.partial(_masked_layernorm_kernel, eps=float(eps))
        cost = pl.CostEstimate(
            flops=8 * N * D,
            transcendentals=N,
            bytes_accessed=itemsize * 2 * N * D
            + jnp.dtype(m.dtype).itemsize * N
            + 2 * jnp.dtype(gamma.dtype).itemsize * D,
        )
        out = pl.pallas_call(
            kernel,
            out_shape=jax.ShapeDtypeStruct((N, D), x.dtype),
            grid=grid,
            in_specs=[
                x_spec,
                pl.BlockSpec((TM, 1), lambda i: (i, 0)),     # native-dtype mask
                prm_spec,
                prm_spec,
            ],
            out_specs=out_spec,
            compiler_params=compiler_params,
            cost_estimate=cost,
        )(xf, m, g, b)
    else:
        kernel = functools.partial(_layernorm_kernel, eps=float(eps))
        cost = pl.CostEstimate(
            flops=8 * N * D,
            transcendentals=N,
            bytes_accessed=itemsize * 2 * N * D
            + 2 * jnp.dtype(gamma.dtype).itemsize * D,
        )
        out = pl.pallas_call(
            kernel,
            out_shape=jax.ShapeDtypeStruct((N, D), x.dtype),
            grid=grid,
            in_specs=[x_spec, prm_spec, prm_spec],
            out_specs=out_spec,
            compiler_params=compiler_params,
            cost_estimate=cost,
        )(xf, g, b)

    return out.reshape(B, T, D)


if __name__ == "__main__":
    # Small config consistent with the module: (batch, seq, num_features).
    batch, seq, num_features = 2, 8, 64
    eps = 1e-5

    key = jax.random.PRNGKey(0)
    kx, km, kg, kb = jax.random.split(key, 4)

    x = jax.random.normal(kx, (batch, seq, num_features), jnp.float32)
    mask = (jax.random.uniform(km, (batch, seq)) > 0.3).astype(jnp.int32)
    gamma = 1.0 + 0.1 * jax.random.normal(kg, (num_features,), jnp.float32)
    beta = 0.1 * jax.random.normal(kb, (num_features,), jnp.float32)

    # block_rows=8 so even this tiny example runs a multi-tile (pipelined) grid.
    out_train = masked_norm_forward(x, mask, gamma, beta, eps=eps,
                                    training=True, block_rows=8)
    out_eval = masked_norm_forward(x, mask, gamma, beta, eps=eps,
                                   training=False, block_rows=8)
    out_train = jax.block_until_ready(out_train)
    out_eval = jax.block_until_ready(out_eval)

    # Plain-JAX reference (matches PyTorch LayerNorm: biased variance + eps).
    xr = x.reshape(-1, num_features)
    mean = xr.mean(-1, keepdims=True)
    var = ((xr - mean) ** 2).mean(-1, keepdims=True)
    normed = (xr - mean) / jnp.sqrt(var + eps) * gamma + beta
    sel = mask.reshape(-1, 1) > 0
    ref_train = jnp.where(sel, normed, xr).reshape(batch, seq, num_features)
    ref_eval = normed.reshape(batch, seq, num_features)

    assert out_train.shape == (batch, seq, num_features)
    assert out_train.dtype == x.dtype
    assert jnp.allclose(out_train, ref_train, atol=1e-4, rtol=1e-4)
    assert jnp.allclose(out_eval, ref_eval, atol=1e-4, rtol=1e-4)

    print("KERNEL_OK")
</pallas_src>

<mosaic_0001>
module attributes {stable_mosaic.version = 11 : i64} {
  func.func @_masked_layernorm_kernel(%arg0: i32, %arg1: memref<8x64xf32, #tpu.memory_space<vmem>>, %arg2: memref<8x1xi32, #tpu.memory_space<vmem>>, %arg3: memref<1x64xf32, #tpu.memory_space<vmem>>, %arg4: memref<1x64xf32, #tpu.memory_space<vmem>>, %arg5: memref<8x64xf32, #tpu.memory_space<vmem>>) attributes {dimension_semantics = [#tpu.dimension_semantics<parallel>], iteration_bounds = array<i64: 2>, scalar_prefetch = 0 : i64, scratch_operands = 0 : i64, tpu.core_type = #tpu.core_type<tc>, window_params = [{transform_indices = @transform_0, window_bounds = array<i64: 8, 64>}, {transform_indices = @transform_1, window_bounds = array<i64: 8, 1>}, {pipeline_mode = #tpu.pipeline_mode<synchronous>, transform_indices = @transform_2, window_bounds = array<i64: 1, 64>}, {pipeline_mode = #tpu.pipeline_mode<synchronous>, transform_indices = @transform_3, window_bounds = array<i64: 1, 64>}, {transform_indices = @transform_4, window_bounds = array<i64: 8, 64>}]} {
    %c0 = arith.constant 0 : index
    %c0_0 = arith.constant 0 : index
    %0 = vector.load %arg1[%c0, %c0_0] : memref<8x64xf32, #tpu.memory_space<vmem>>, vector<8x64xf32>
    %cst = arith.constant dense<0.000000e+00> : vector<8xf32>
    %1 = vector.multi_reduction <add>, %0, %cst [1] : vector<8x64xf32> to vector<8xf32>
    %2 = vector.shape_cast %1 : vector<8xf32> to vector<8x1xf32>
    %3 = arith.mulf %0, %0 : vector<8x64xf32>
    %cst_1 = arith.constant dense<0.000000e+00> : vector<8xf32>
    %4 = vector.multi_reduction <add>, %3, %cst_1 [1] : vector<8x64xf32> to vector<8xf32>
    %5 = vector.shape_cast %4 : vector<8xf32> to vector<8x1xf32>
    %cst_2 = arith.constant 1.562500e-02 : f32
    %6 = vector.broadcast %cst_2 : f32 to vector<8x1xf32>
    %7 = arith.mulf %2, %6 : vector<8x1xf32>
    %cst_3 = arith.constant 1.562500e-02 : f32
    %8 = vector.broadcast %cst_3 : f32 to vector<8x1xf32>
    %9 = arith.mulf %5, %8 : vector<8x1xf32>
    %10 = arith.mulf %7, %7 : vector<8x1xf32>
    %11 = arith.subf %9, %10 : vector<8x1xf32>
    %cst_4 = arith.constant 0.000000e+00 : f32
    %12 = vector.broadcast %cst_4 : f32 to vector<8x1xf32>
    %13 = arith.maximumf %11, %12 : vector<8x1xf32>
    %cst_5 = arith.constant 9.99999974E-6 : f32
    %14 = vector.broadcast %cst_5 : f32 to vector<8x1xf32>
    %15 = arith.addf %13, %14 : vector<8x1xf32>
    %16 = math.rsqrt %15 : vector<8x1xf32>
    %c0_6 = arith.constant 0 : index
    %c0_7 = arith.constant 0 : index
    %17 = vector.load %arg3[%c0_6, %c0_7] : memref<1x64xf32, #tpu.memory_space<vmem>>, vector<1x64xf32>
    %c0_8 = arith.constant 0 : index
    %c0_9 = arith.constant 0 : index
    %18 = vector.load %arg4[%c0_8, %c0_9] : memref<1x64xf32, #tpu.memory_space<vmem>>, vector<1x64xf32>
    %19 = vector.broadcast %7 : vector<8x1xf32> to vector<8x64xf32>
    %20 = arith.subf %0, %19 : vector<8x64xf32>
    %21 = vector.broadcast %16 : vector<8x1xf32> to vector<8x64xf32>
    %22 = arith.mulf %20, %21 : vector<8x64xf32>
    %23 = vector.broadcast %17 : vector<1x64xf32> to vector<8x64xf32>
    %24 = arith.mulf %22, %23 : vector<8x64xf32>
    %25 = vector.broadcast %18 : vector<1x64xf32> to vector<8x64xf32>
    %26 = arith.addf %24, %25 : vector<8x64xf32>
    %c0_10 = arith.constant 0 : index
    %c0_11 = arith.constant 0 : index
    %27 = vector.load %arg2[%c0_10, %c0_11] : memref<8x1xi32, #tpu.memory_space<vmem>>, vector<8x1xi32>
    %c0_i32 = arith.constant 0 : i32
    %28 = vector.broadcast %c0_i32 : i32 to vector<8x1xi32>
    %29 = arith.cmpi sgt, %27, %28 : vector<8x1xi32>
    %30 = vector.shape_cast %29 : vector<8x1xi1> to vector<8x1xi1>
    %31 = vector.broadcast %30 : vector<8x1xi1> to vector<8x64xi1>
    %32 = arith.select %31, %26, %0 : vector<8x64xi1>, vector<8x64xf32>
    %c0_12 = arith.constant 0 : index
    %c0_13 = arith.constant 0 : index
    %33 = vector.load %arg5[%c0_12, %c0_13] : memref<8x64xf32, #tpu.memory_space<vmem>>, vector<8x64xf32>
    tpu.vector_store %arg5[%c0_12, %c0_13], %32 {strides = array<i32>} : memref<8x64xf32, #tpu.memory_space<vmem>>, vector<8x64xf32>,
    return
  }
  func.func @transform_0(%arg0: i32) -> (i32, i32) {
    %c0_i32 = arith.constant 0 : i32
    %c0_i32_0 = arith.constant 0 : i32
    return %arg0, %c0_i32 : i32, i32
  }
  func.func @transform_1(%arg0: i32) -> (i32, i32) {
    %c0_i32 = arith.constant 0 : i32
    %c0_i32_0 = arith.constant 0 : i32
    return %arg0, %c0_i32 : i32, i32
  }
  func.func @transform_2(%arg0: i32) -> (i32, i32) {
    %c0_i32 = arith.constant 0 : i32
    %c0_i32_0 = arith.constant 0 : i32
    %c0_i32_1 = arith.constant 0 : i32
    return %c0_i32, %c0_i32_0 : i32, i32
  }
  func.func @transform_3(%arg0: i32) -> (i32, i32) {
    %c0_i32 = arith.constant 0 : i32
    %c0_i32_0 = arith.constant 0 : i32
    %c0_i32_1 = arith.constant 0 : i32
    return %c0_i32, %c0_i32_0 : i32, i32
  }
  func.func @transform_4(%arg0: i32) -> (i32, i32) {
    %c0_i32 = arith.constant 0 : i32
    %c0_i32_0 = arith.constant 0 : i32
    return %arg0, %c0_i32 : i32, i32
  }
}

</mosaic_0001>

<bundles_post_ra>
// kernel: tpu_custom_call.1
= control target key start
LH: loop header
LB: loop body
LE: loop exit
PB: predicated region body
PF: predicated region fallthrough
CT: control target
= control target key end

     0   :  { %9 = vsyncpa [#allocation3], 0  ;;  %s598_s0 = inlined_call_operand.vmem [shape: f32[16,64], index: 0, kind: input, shape index: {}]   ;;  %s599_s1 = inlined_call_operand.vmem [shape: s32[16,1], index: 1, kind: input, shape index: {}]   ;;  %s600_s2 = inlined_call_operand.vmem [shape: f32[1,64], index: 2, kind: input, shape index: {}]   ;;  %s601_s3 = inlined_call_operand.vmem [shape: f32[1,64], index: 3, kind: input, shape index: {}]   ;;  %s602_s4 = inlined_call_operand.hbm [shape: f32[16,64], index: 4, kind: output, shape index: {}]  }
   0x1   :  { %11 = vsyncpa [#allocation3 + $0x1], 0  ;;  %s486_s15 = smov 0   ;;  %s488_s16 = smov 0  }
   0x2   :  { %s490_s17 = smov 0   ;;  %s492_s18 = smov 0  }
   0x3 LB: > { %s507_s19 = sadd.s32 4294967295, %s457_s18   ;;  %s338_s20 = sadd.s32 4294967294, %s457_s18   ;;  %s457_s18 = sphi %s492_s18, %s608_s18   ;;  %s453_s17 = sphi %s490_s17, %s607_s17   ;;  %s449_s16 = sphi %s488_s16, %s606_s16   ;;  %s445_s15 = sphi %s486_s15, %s605_s15  }
   0x4   : > { %s511_s21 = sadd.s32 1, %s457_s18   ;;  %s118_s22 = sadd.s32 1, %s453_s17 }
   0x5   : > { %s115_s23 = ssub.s32 %s457_s18, %s511_s21  ;;  %p128_p0 = scmp.ne.s32.totalorder %s453_s17, %s449_s16 }
   0x6   : > { %p116_p1 = scmp.eq.s32.totalorder %s115_s23, 0  ;;  %p129_p2 = scmp.eq.s32.totalorder %s507_s19, 1 }
   0x7   : > { %p134_p3 = scmp.ne.s32.totalorder %s449_s16, %s445_s15  ;;  %p135_p4 = scmp.eq.s32.totalorder %s338_s20, 1 }
   0x8   : > { %s522_s24 = scalar_select %p116_p1, %s453_s17, %s118_s22  }
   0x9   : > { %p524_p5 = por %p129_p2, %p128_p0  ;;  %p528_p6 = por %p135_p4, %p134_p3 }
   0xa   : > { %p341_p7 = scmp.ge.s32.totalorder %s457_s18, 1  ;;  %p173_p8 = scmp.lt.s32.totalorder %s457_s18, 3 }
   0xc   : > { %p174_p9 = pnand %p341_p7, %p173_p8 }
   0xd   : > { %p202_p10 = scmp.lt.s32.totalorder (!%p174_p9), %s507_s19, 1  ;;  %v459_v0 = vmov (!%p174_p9), 0   ;;  %vm211_vm0 = vcmask (!%p174_p9), 523264   ;;  %s199_s9 = sand.u32 (!%p174_p9), 1, %s449_s16   ;;  %v345_v17 = vld [vmem:[%s600_s2] ss:$0 sm:$0xff] (!%p174_p9) }
   0xe   : > { %177 = sbr.rel (%p174_p9) target bundleno = 213 (0xd5), region = 36  ;;  %391 = vset.pattern.permute.xlu1 (!%p174_p9), %v459_v0  ;;  %392 = vset.pattern.permute.xlu0 (!%p174_p9), %v459_v0  ;;  %s342_s10 = sshll.u32 (!%p174_p9), %s199_s9, 3  ;;  %v346_v20 = vld [vmem:[%s601_s3] ss:$0 sm:$0xff] (!%p174_p9) }
   0xf   : > { %s348_s20 = sshll.u32 (!%p174_p9), %s507_s19, 7  ;;  %s201_s22 = scalar_lea.vmem (!%p174_p9), [#allocation2], %s342_s10 }
  0x10   : > { %s267_s23 = sshll.u32 (!%p174_p9), %s201_s22, 4  ;;  %s555_s29 = scalar_lea.hbm (!%p174_p9), %s602_s4, %s348_s20  ;;  %s557_s23 = int_to_ptr.vmem [resolvable:$true] %s267_s23 }
  0x11   : > { %s254_s30 = scalar_lea.sflag (!%p174_p9), [#allocation3], %s199_s9 }
  0x15   : > { %s203_s27 = scalar_select %p202_p10, %s507_s19, 1 }
  0x16   : > { %s460_s19 = smov [#allocation2]  }
  0x17   : > { %s343_s28 = sshll.u32 %s203_s27, 3  ;;  %s399_s6 = sshll.u32 %s460_s19, 4  ;;  %s400_s6 = int_to_ptr.vmem [resolvable:$false] %s399_s6 }
  0x18   : > { %s205_s5 = scalar_lea.vmem %s598_s0, %s343_s28  ;;  %s209_s8 = scalar_lea.vmem %s599_s1, %s343_s28 }
  0x19   : > { %v210_v1 = vld [vmem:[%s205_s5] sm:$0xff]  ;;  %s395_s5 = scalar_lea.vmem %s557_s23, 128  ;;  %s401_s7 = scalar_lea.vmem %s400_s6, 256 }
  0x1a   : > { %v244_v2 = vld [vmem:[%s209_s8] sm:$0xff]  ;;  %v212_v3 = vsel %vm211_vm0, %v210_v1, 0.0  ;;  %v215_v4 = vmul.f32 %v210_v1, %v210_v1  ;;  %p396_p11 = scmp.ne.s32.totalorder %s557_s23, %s395_s5  ;;  %p402_p0 = scmp.lt.s32.totalorder %s557_s23, %s400_s6 }
  0x1b   : > { %vm245_vm1 = vcmp.gt.s32.totalorder %v244_v2, 0  ;;  %213 = vadd.xlane.f32.xlu0 %v212_v3  ;;  %p403_p1 = scmp.lt.s32.totalorder %s401_s7, %s395_s5 }
  0x1c   : > { %v246_v5 = vsel %vm245_vm1, 1, %v459_v0  ;;  %v216_v6 = vsel %vm211_vm0, %v215_v4, 0.0  ;;  %p397_p12 = pnand %p396_p11, %p524_p5 }
  0x1d   : > { %248 = vperm.xlu1 %391, %v246_v5   ;;  %p404_p2 = por %p403_p1, %p402_p0 }
  0x1e   : > { %p398_p13 = pneg %p397_p12 }
  0x1f   : > { %217 = vadd.xlane.f32.xlu0 %v216_v6 }
  0x20   : > { %p405_p3 = pnand %p404_p2, %p398_p13 }
  0x9c   : > { %v249_v18 = vpop.permute.xlu1 %248 }
  0x9d   : > { %vm250_vm2 = vcmp.eq.s32.totalorder %v249_v18, 1 }
  0xa8   : > { %v214_v7 = vpop.xlane.xlu0 %213 }
  0xa9   : > { %v219_v8 = vmul.f32 0.015625, %v214_v7 }
  0xab   : > { %v221_v10 = vmul.f32 %v219_v8, %v219_v8  ;;  %v228_v15 = vsub.f32 %v210_v1, %v219_v8 }
  0xac   : > { %v218_v9 = vpop.xlane.xlu0 %217 }
  0xad   : > { %v220_v11 = vmul.f32 0.015625, %v218_v9 }
  0xaf   : > { %v222_v12 = vsub.f32 %v220_v11, %v221_v10 }
  0xb1   : > { %v223_v13 = vmax.f32 %v222_v12, 0.0 }
  0xb3   : > { %v224_v14 = vadd.f32 1e-05, %v223_v13 }
  0xb5   : > { %393 = vrsqrt.f32 %v224_v14 }
  0xbf   : > { %v394_v16 = vpop.eup %393 }
  0xc0   : > { %v229_v19 = vmul.f32 %v394_v16, %v228_v15 }
  0xc2   : > { %v236_v21 = vmul.f32 %v345_v17, %v229_v19 }
  0xc4   : > { %v243_v22 = vadd.f32 %v346_v20, %v236_v21 }
  0xc6   : > { %v251_v23 = vsel %vm250_vm2, %v243_v22, %v210_v1 }
  0xc7   : > { %252 = vst.msk [vmem:[%s201_s22] sm:$0xff] %vm211_vm0, %v251_v23 }
  0xc8   : > { %408 = shalt.err (!%p405_p3)
}
  0xc9   : > { %s409_s8 = scalar_lea.hbm %s555_s29, 128  ;;  %s413_s11 = scalar_lea.hbm %s602_s4, 256 }
  0xca   : > { %p410_p4 = scmp.ne.s32.totalorder %s555_s29, %s409_s8  ;;  %p414_p9 = scmp.lt.u32.totalorder %s555_s29, %s602_s4 }
  0xcb   : > { %p415_p10 = scmp.lt.u32.totalorder %s413_s11, %s409_s8  ;;  %p417_p12 = scmp.lt.u32.totalorder %s409_s8, %s555_s29 }
  0xcc   : > { %p411_p7 = pnand %p410_p4, %p524_p5 }
  0xcd   : > { %p416_p11 = por %p415_p10, %p414_p9 }
  0xce   : > { %p412_p8 = pneg %p411_p7 }
  0xcf   : > { %p418_p13 = por %p417_p12, %p416_p11 }
  0xd1   : > { %p419_p0 = pnand %p418_p13, %p412_p8 }
  0xd3   : > { %422 = shalt.err (!%p419_p0)
}
  0xd4   : > { %351 = dma.vmem_to_hbm [thread:$0]  (%p524_p5), %s557_s23, 128, %s555_s29, %s254_s30  }
  0xd5 PF: > { %p357_p1 = scmp.ge.s32.totalorder %s457_s18, 2  ;;  %s279_s14 = sand.u32 1, %s445_s15  }
  0xd6   : > { %s280_s20 = scalar_lea.sflag [#allocation3], %s279_s14 }
  0xd7   : > { %p354_p2 = pnand %p357_p1, %p528_p6 }
  0xd9   : > { %440 = dma.done.wait (!%p354_p2), %s280_s20, 128  }
  0xda   : > { %442 = vsyncadd (!%p354_p2), %s280_s20, 4294967168  ;;  %p14_p3 = scmp.ge.s32.totalorder %s511_s21, 4   ;;  %s605_s15 = smov %s449_s16 }
  0xdb   : > { %s606_s16 = smov %s453_s17  ;;  %s607_s17 = smov %s522_s24 }
  0xdc   : > { %s608_s18 = smov %s511_s21  ;;  %16 = sbr.rel (!%p14_p3) target bundleno = 3 (0x3), region = 74 }
  0xe3   :  { %285 = vsyncpa [#allocation3], 1 }
  0xe4   :  { %287 = vsyncpa [#allocation3 + $0x1], 1 }

</bundles_post_ra>
